<compile_context>
chip_gen: v6e
topology: v6e:2x2x1
jax: 0.10.0
libtpu: 0.0.40
codegen_flags: <defaults>
</compile_context>

<pallas_src>
import jax
import jax.numpy as jnp
from jax.experimental import pallas as pl
from jax.experimental.pallas import tpu as pltpu


def _modality_sep_kernel(x_ref, w_ref, b_ref, vis_ref, txt_ref):
    """One row tile: fused (vis|txt) projection on the MXU, f32 accumulation.

    x_ref:   (tm, D)  input rows (original dtype; cast per tile below)
    w_ref:   (D, 2D)  fused, pre-transposed weight [w_vis.T | w_txt.T]
    b_ref:   (1, 2D)  fused bias (f32)
    vis_ref: (tm, D)  output half 0
    txt_ref: (tm, D)  output half 1
    """
    d = vis_ref.shape[-1]
    x = x_ref[...].astype(w_ref.dtype)            # in-kernel cast (VPU filler)
    y = jnp.dot(x, w_ref[...], preferred_element_type=jnp.float32)
    y = y + b_ref[...]                            # bias is f32
    vis_ref[...] = y[:, :d].astype(vis_ref.dtype)
    txt_ref[...] = y[:, d:].astype(txt_ref.dtype)


def fuse_params(w_vis, b_vis, w_txt, b_txt, matmul_dtype=jnp.bfloat16):
    """Build the fused (D, 2D) weight and (1, 2D) bias ONCE at setup time.

    PyTorch Linear stores weight as (out, in); we pre-transpose to (in, out) so
    the kernel does a plain x @ W with no in-kernel transpose, and concatenate
    the two projections along the output dim.
    """
    d = w_vis.shape[0]
    w_cat = jnp.concatenate([w_vis.T, w_txt.T], axis=1)          # (D, 2D)
    if matmul_dtype is not None:
        w_cat = w_cat.astype(matmul_dtype)
    b_cat = jnp.concatenate([b_vis, b_txt]).reshape(1, 2 * d).astype(jnp.float32)
    return w_cat, b_cat


def _round_up(v, m):
    return ((v + m - 1) // m) * m


def modality_seperation(x, w_cat, b_cat, *, block_rows=None, out_dtype=None):
    """x: (..., D) -> (vis_fea, txt_fea), each (..., D).

    Semantics: vis = x @ w_vis.T + b_vis ; txt = x @ w_txt.T + b_txt,
    with (w_cat, b_cat) the fused params from fuse_params().
    """
    orig_shape = x.shape
    d = orig_shape[-1]
    assert w_cat.shape == (d, 2 * d), "w_cat must be the fused (D, 2D) weight"
    if out_dtype is None:
        out_dtype = x.dtype

    x2d = x.reshape(-1, d)                       # (N, D), no copy
    n = x2d.shape[0]

    # Per-generation VMEM capacity (with headroom) and default row tile.
    try:
        vmem_cap = int(pltpu.get_tpu_info().vmem_capacity_bytes)
    except Exception:
        vmem_cap = 64 * 1024 * 1024              # conservative (v7x-sized)
    if block_rows is None:
        block_rows = 1024 if vmem_cap >= (100 << 20) else 512

    # Row tile: multiple of 16 (bf16 sublane packing); if it would cover all
    # rows, use a single full-extent block (always a legal block shape).
    tm = min(_round_up(block_rows, 16), _round_up(n, 16))
    if tm >= n:
        tm = n
    grid = (pl.cdiv(n, tm),)                     # boundary block masked by Pallas

    x_bytes = jnp.dtype(x2d.dtype).itemsize
    w_bytes = jnp.dtype(w_cat.dtype).itemsize
    o_bytes = jnp.dtype(out_dtype).itemsize

    # Explicit VMEM budget: double-buffered x tile + two double-buffered output
    # tiles + resident fused weight (double-buffer allocation) + bias.
    footprint = (2 * tm * d * x_bytes                # x tiles
                 + 2 * 2 * tm * d * o_bytes          # vis + txt tiles
                 + 2 * d * 2 * d * w_bytes           # resident fused weight
                 + 2 * 2 * d * 4)                    # bias
    vmem_limit = int(footprint * 1.5)
    vmem_limit = max(vmem_limit, 16 * 1024 * 1024)   # never starve the compiler
    vmem_limit = min(vmem_limit, int(vmem_cap * 0.82))  # leave compiler headroom

    bytes_accessed = (n * d * x_bytes                # read x
                      + d * 2 * d * w_bytes          # read fused weight
                      + 2 * d * 4                    # read bias
                      + 2 * n * d * o_bytes)         # write vis + txt
    cost = pl.CostEstimate(flops=4 * n * d * d,
                           bytes_accessed=bytes_accessed,
                           transcendentals=0)

    vis2d, txt2d = pl.pallas_call(
        _modality_sep_kernel,
        out_shape=(jax.ShapeDtypeStruct((n, d), out_dtype),
                   jax.ShapeDtypeStruct((n, d), out_dtype)),
        grid=grid,
        in_specs=[
            pl.BlockSpec((tm, d), lambda i: (i, 0)),        # streamed rows of x
            pl.BlockSpec((d, 2 * d), lambda i: (0, 0)),     # VMEM-resident W_cat
            pl.BlockSpec((1, 2 * d), lambda i: (0, 0)),     # VMEM-resident bias
        ],
        out_specs=[
            pl.BlockSpec((tm, d), lambda i: (i, 0)),        # vis rows
            pl.BlockSpec((tm, d), lambda i: (i, 0)),        # txt rows
        ],
        compiler_params=pltpu.CompilerParams(
            dimension_semantics=("parallel",),
            vmem_limit_bytes=vmem_limit,
        ),
        cost_estimate=cost,
    )(x2d, w_cat, b_cat)

    return vis2d.reshape(orig_shape), txt2d.reshape(orig_shape)


def modality_seperation_from_linear(x, w_vis, b_vis, w_txt, b_txt,
                                    *, matmul_dtype=jnp.bfloat16, **kw):
    """Convenience wrapper taking raw nn.Linear params (fuses every call).
    Prefer calling fuse_params() once and modality_seperation() in hot loops."""
    w_cat, b_cat = fuse_params(w_vis, b_vis, w_txt, b_txt, matmul_dtype)
    return modality_seperation(x, w_cat, b_cat, **kw)


def init_params(key, fea_dim, dtype=jnp.float32):
    """Deterministic init mimicking nn.Linear's uniform(-1/sqrt(in), 1/sqrt(in))."""
    k1, k2, k3, k4 = jax.random.split(key, 4)
    bound = 1.0 / (fea_dim ** 0.5)
    w_vis = jax.random.uniform(k1, (fea_dim, fea_dim), dtype, -bound, bound)
    b_vis = jax.random.uniform(k2, (fea_dim,), dtype, -bound, bound)
    w_txt = jax.random.uniform(k3, (fea_dim, fea_dim), dtype, -bound, bound)
    b_txt = jax.random.uniform(k4, (fea_dim,), dtype, -bound, bound)
    return w_vis, b_vis, w_txt, b_txt


if __name__ == "__main__":
    key = jax.random.PRNGKey(0)
    batch, seq, fea_dim = 2, 8, 32

    kx, kp = jax.random.split(key)
    x = jax.random.normal(kx, (batch, seq, fea_dim), jnp.float32)
    w_vis, b_vis, w_txt, b_txt = init_params(kp, fea_dim)

    # Fuse once (hoisted out of the per-call path), then run the kernel.
    w_cat, b_cat = fuse_params(w_vis, b_vis, w_txt, b_txt)
    vis_fea, txt_fea = modality_seperation(x, w_cat, b_cat)
    jax.block_until_ready((vis_fea, txt_fea))

    # Reference check in plain JAX (PyTorch semantics: x @ W.T + b).
    # bf16 matmul operands with f32 accumulation -> loosened tolerance.
    vis_ref = x @ w_vis.T + b_vis
    txt_ref = x @ w_txt.T + b_txt
    assert vis_fea.shape == x.shape and txt_fea.shape == x.shape
    assert jnp.allclose(vis_fea, vis_ref, atol=5e-2, rtol=5e-2), "vis mismatch"
    assert jnp.allclose(txt_fea, txt_ref, atol=5e-2, rtol=5e-2), "txt mismatch"

    print("KERNEL_OK")
</pallas_src>

<mosaic_0001>
module attributes {stable_mosaic.version = 11 : i64} {
  func.func @_modality_sep_kernel(%arg0: i32, %arg1: memref<16x32xf32, #tpu.memory_space<vmem>>, %arg2: memref<32x64xbf16, #tpu.memory_space<vmem>>, %arg3: memref<1x64xf32, #tpu.memory_space<vmem>>, %arg4: memref<16x32xf32, #tpu.memory_space<vmem>>, %arg5: memref<16x32xf32, #tpu.memory_space<vmem>>) attributes {dimension_semantics = [#tpu.dimension_semantics<parallel>], iteration_bounds = array<i64: 1>, scalar_prefetch = 0 : i64, scratch_operands = 0 : i64, tpu.core_type = #tpu.core_type<tc>, window_params = [{transform_indices = @transform_0, window_bounds = array<i64: 16, 32>}, {pipeline_mode = #tpu.pipeline_mode<synchronous>, transform_indices = @transform_1, window_bounds = array<i64: 32, 64>}, {pipeline_mode = #tpu.pipeline_mode<synchronous>, transform_indices = @transform_2, window_bounds = array<i64: 1, 64>}, {transform_indices = @transform_3, window_bounds = array<i64: 16, 32>}, {transform_indices = @transform_4, window_bounds = array<i64: 16, 32>}]} {
    %c0 = arith.constant 0 : index
    %c0_0 = arith.constant 0 : index
    %0 = vector.load %arg1[%c0, %c0_0] : memref<16x32xf32, #tpu.memory_space<vmem>>, vector<16x32xf32>
    %1 = arith.truncf %0 : vector<16x32xf32> to vector<16x32xbf16>
    %c0_1 = arith.constant 0 : index
    %c0_2 = arith.constant 0 : index
    %2 = vector.load %arg2[%c0_1, %c0_2] : memref<32x64xbf16, #tpu.memory_space<vmem>>, vector<32x64xbf16>
    %cst = arith.constant dense<0.000000e+00> : vector<16x64xf32>
    %3 = tpu.matmul %1, %2, %cst {dimension_numbers = #tpu.dot_dimension_numbers<[1], [0], [0], [1], [0, 0, 1, 1], [], []>} : vector<16x32xbf16>, vector<32x64xbf16>, vector<16x64xf32> -> vector<16x64xf32>
    %c0_3 = arith.constant 0 : index
    %c0_4 = arith.constant 0 : index
    %4 = vector.load %arg3[%c0_3, %c0_4] : memref<1x64xf32, #tpu.memory_space<vmem>>, vector<1x64xf32>
    %5 = vector.broadcast %4 : vector<1x64xf32> to vector<16x64xf32>
    %6 = arith.addf %3, %5 : vector<16x64xf32>
    %7 = vector.extract_strided_slice %6 {offsets = [0, 0], sizes = [16, 32], strides = [1, 1]} : vector<16x64xf32> to vector<16x32xf32>
    %c0_5 = arith.constant 0 : index
    %c0_6 = arith.constant 0 : index
    %8 = vector.load %arg4[%c0_5, %c0_6] : memref<16x32xf32, #tpu.memory_space<vmem>>, vector<16x32xf32>
    tpu.vector_store %arg4[%c0_5, %c0_6], %7 {strides = array<i32>} : memref<16x32xf32, #tpu.memory_space<vmem>>, vector<16x32xf32>,
    %9 = vector.extract_strided_slice %6 {offsets = [0, 32], sizes = [16, 32], strides = [1, 1]} : vector<16x64xf32> to vector<16x32xf32>
    %c0_7 = arith.constant 0 : index
    %c0_8 = arith.constant 0 : index
    %10 = vector.load %arg5[%c0_7, %c0_8] : memref<16x32xf32, #tpu.memory_space<vmem>>, vector<16x32xf32>
    tpu.vector_store %arg5[%c0_7, %c0_8], %9 {strides = array<i32>} : memref<16x32xf32, #tpu.memory_space<vmem>>, vector<16x32xf32>,
    return
  }
  func.func @transform_0(%arg0: i32) -> (i32, i32) {
    %c0_i32 = arith.constant 0 : i32
    %c0_i32_0 = arith.constant 0 : i32
    return %arg0, %c0_i32 : i32, i32
  }
  func.func @transform_1(%arg0: i32) -> (i32, i32) {
    %c0_i32 = arith.constant 0 : i32
    %c0_i32_0 = arith.constant 0 : i32
    %c0_i32_1 = arith.constant 0 : i32
    return %c0_i32, %c0_i32_0 : i32, i32
  }
  func.func @transform_2(%arg0: i32) -> (i32, i32) {
    %c0_i32 = arith.constant 0 : i32
    %c0_i32_0 = arith.constant 0 : i32
    %c0_i32_1 = arith.constant 0 : i32
    return %c0_i32, %c0_i32_0 : i32, i32
  }
  func.func @transform_3(%arg0: i32) -> (i32, i32) {
    %c0_i32 = arith.constant 0 : i32
    %c0_i32_0 = arith.constant 0 : i32
    return %arg0, %c0_i32 : i32, i32
  }
  func.func @transform_4(%arg0: i32) -> (i32, i32) {
    %c0_i32 = arith.constant 0 : i32
    %c0_i32_0 = arith.constant 0 : i32
    return %arg0, %c0_i32 : i32, i32
  }
}

</mosaic_0001>

<bundles_post_ra>
// kernel: tpu_custom_call.1
= control target key start
LH: loop header
LB: loop body
LE: loop exit
PB: predicated region body
PF: predicated region fallthrough
CT: control target
= control target key end

     0   :  { %10 = vsyncpa [#allocation3], 0  ;;  %s345_s0 = inlined_call_operand.hbm [shape: f32[16,32], index: 0, kind: input, shape index: {}]   ;;  %s346_s1 = inlined_call_operand.hbm [shape: bf16[32,64], index: 1, kind: input, shape index: {}]   ;;  %s347_s2 = inlined_call_operand.vmem [shape: f32[1,64], index: 2, kind: input, shape index: {}]   ;;  %s348_s3 = inlined_call_operand.hbm [shape: f32[16,32], index: 3, kind: output, shape index: {0}]   ;;  %s349_s4 = inlined_call_operand.hbm [shape: f32[16,32], index: 4, kind: output, shape index: {1}]  }
   0x1   :  { %11 = vsyncpa [#allocation6], 0 }
   0x2   :  { %12 = vsyncpa [#allocation4], 0 }
   0x3   :  { %13 = vsyncpa [#allocation9], 0  ;;  %s280_s15 = smov [#allocation2]  }
   0x4   :  { %s19_s16 = sshll.u32 %s280_s15, 4  ;;  %s20_s16 = int_to_ptr.vmem [resolvable:$true] %s19_s16 }
   0x5   :  { %s200_s17 = scalar_lea.vmem %s20_s16, 256  ;;  %p205_p1 = scmp.lt.s32.totalorder %s20_s16, %s20_s16 }
   0x6   :  { %p201_p0 = scmp.ne.s32.totalorder %s20_s16, %s200_s17  ;;  %p206_p2 = scmp.lt.s32.totalorder %s200_s17, %s200_s17 }
   0x8   :  { %p207_p3 = por %p206_p2, %p205_p1 }
   0xa   :  { %p208_p4 = pnand %p207_p3, %p201_p0 }
   0xc   :  { %211 = shalt.err (!%p208_p4)
}
   0xd   :  { %s281_s18 = smov 128   ;;  %s282_s19 = smov 8  }
   0xe   :  { %25 = dma.hbm_to_vmem [thread:$0]  %s345_s0, 256, %s20_s16, [#allocation3], %s281_s18, %s281_s18, %s282_s19  }
   0xf   :  { %s283_s22 = smov [#allocation5]  }
  0x10   :  { %s31_s23 = sshll.u32 %s283_s22, 4  ;;  %s32_s23 = int_to_ptr.vmem [resolvable:$true] %s31_s23 }
  0x11   :  { %s220_s24 = scalar_lea.vmem %s32_s23, 256  ;;  %p225_p6 = scmp.lt.s32.totalorder %s32_s23, %s32_s23 }
  0x12   :  { %p221_p5 = scmp.ne.s32.totalorder %s32_s23, %s220_s24  ;;  %p226_p7 = scmp.lt.s32.totalorder %s220_s24, %s220_s24 }
  0x14   :  { %p227_p8 = por %p226_p7, %p225_p6 }
  0x16   :  { %p228_p9 = pnand %p227_p8, %p221_p5 }
  0x18   :  { %231 = shalt.err (!%p228_p9)
}
  0x19   :  { %s284_s25 = smov 64   ;;  %s285_s26 = smov 4  }
  0x1a   :  { %37 = dma.hbm_to_vmem [thread:$0]  %s346_s1, 256, %s32_s23, [#allocation6], %s284_s25, %s284_s25, %s285_s26  }
  0x1b   :  { %272 = dma.done.wait [#allocation3], 256  }
  0x1c   :  { %273 = vsyncadd [#allocation3], 4294967040 }
  0x1d   :  { %274 = dma.done.wait [#allocation6], 256  }
  0x1e   :  { %275 = vsyncadd [#allocation6], 4294967040  ;;  %v286_v0 = vmov 0.0   ;;  %vm287_vm0 = vmmov 0   ;;  %v190_v1 = vld [vmem:[#allocation5 + $0x8] sm:$0xff]   ;;  %v191_v2 = vld [vmem:[#allocation5] sm:$0xff]  }
  0x1f   :  { %171 = vmatprep.subr.bf16.mxu0 %v286_v0  ;;  %175 = vmatprep.mubr.msk.bf16.mxu0 %vm287_vm0, %v286_v0  ;;  %v47_v3 = vld [vmem:[#allocation2] sm:$0xff]  ;;  %v48_v4 = vld [vmem:[#allocation2 + $0x8] sm:$0xff]  ;;  %vm73_vm1 = vcmask 261120   ;;  %s288_s29 = smov [#allocation7]   ;;  %s289_s5 = smov 96  }
  0x20   :  { %172 = vmatpush3.bf16.msra.mxu0 %v190_v1  ;;  %v49_v5 = vpack.c.bf16 %v48_v4, %v47_v3  ;;  %v164_v6 = vld [vmem:[%s347_s2] ss:$0 sm:$0xff]  ;;  %s135_s30 = sshll.u32 %s288_s29, 4  ;;  %s136_s30 = int_to_ptr.vmem [resolvable:$true] %s135_s30 }
  0x21   :  { %173 = vmatprep.subr.bf16.mxu0 %v286_v0  ;;  %s232_s6 = scalar_lea.vmem %s136_s30, 256  ;;  %p237_p11 = scmp.lt.s32.totalorder %s136_s30, %s136_s30 }
  0x22   :  { %p233_p10 = scmp.ne.s32.totalorder %s136_s30, %s232_s6  ;;  %p238_p12 = scmp.lt.s32.totalorder %s232_s6, %s232_s6 }
  0x24   :  { %174 = vmatpush3.bf16.msra.mxu0 %v191_v2  ;;  %p239_p13 = por %p238_p12, %p237_p11 }
  0x26   :  { %p240_p0 = pnand %p239_p13, %p233_p10 }
  0x27   :  { %176 = vmatmul.mubr.msk.bf16.vlgmr.msra.gmra.mxu0 %vm73_vm1, %v49_v5 }
  0xe7   :  { %v111_v7 = vpop.f32.mrf.mxu0 }
  0xe8   :  { %v112_v8 = vadd.f32 %v164_v6, %v111_v7 }
  0xe9   :  { %v177_v9 = vpop.f32.mrf.mxu0 }
  0xea   :  { %118 = vst.msk [vmem:[#allocation7] sm:$0xff] %vm73_vm1, %v112_v8  ;;  %122 = vrot.lane.b32.xlu0 %v112_v8, %s289_s5 }
  0xeb   :  { %v114_v10 = vpop.f32.mrf.mxu0 }
  0xec   :  { %v115_v11 = vadd.f32 %v164_v6, %v114_v10 }
  0xed   :  { %v178_v12 = vpop.f32.mrf.mxu0 }
  0xee   :  { %119 = vst.msk [vmem:[#allocation7 + $0x8] sm:$0xff] %vm73_vm1, %v115_v11  ;;  %124 = vrot.lane.b32.xlu0 %v115_v11, %s289_s5 }
  0xef   :  { %243 = shalt.err (!%p240_p0)
}
  0xf0   :  { %141 = dma.vmem_to_hbm [thread:$0]  %s136_s30, 256, %s348_s3, [#allocation4], %s281_s18, %s281_s18, %s282_s19  }
  0xf1   :  { %s290_s8 = smov [#allocation8]  }
  0xf2   :  { %s147_s9 = sshll.u32 %s290_s8, 4  ;;  %s148_s9 = int_to_ptr.vmem [resolvable:$true] %s147_s9 }
  0xf3   :  { %s252_s10 = scalar_lea.vmem %s148_s9, 256  ;;  %p257_p2 = scmp.lt.s32.totalorder %s148_s9, %s148_s9 }
  0xf4   :  { %p253_p1 = scmp.ne.s32.totalorder %s148_s9, %s252_s10  ;;  %p258_p3 = scmp.lt.s32.totalorder %s252_s10, %s252_s10 }
  0xf6   :  { %p259_p4 = por %p258_p3, %p257_p2 }
  0xf8   :  { %p260_p5 = pnand %p259_p4, %p253_p1 }
 0x15c   :  { %v123_v13 = vpop.permute.xlu0 %122 }
 0x15d   :  { %128 = vst.msk [vmem:[#allocation8] sm:$0xff] %vm73_vm1, %v123_v13 }
 0x160   :  { %v125_v14 = vpop.permute.xlu0 %124 }
 0x161   :  { %129 = vst.msk [vmem:[#allocation8 + $0x8] sm:$0xff] %vm73_vm1, %v125_v14 }
 0x162   :  { %263 = shalt.err (!%p260_p5)
}
 0x163   :  { %153 = dma.vmem_to_hbm [thread:$0]  %s148_s9, 256, %s349_s4, [#allocation9], %s281_s18, %s281_s18, %s282_s19  }
 0x164   :  { %276 = dma.done.wait [#allocation4], 256  }
 0x165   :  { %277 = vsyncadd [#allocation4], 4294967040 }
 0x166   :  { %278 = dma.done.wait [#allocation9], 256  }
 0x167   :  { %279 = vsyncadd [#allocation9], 4294967040 }
 0x168   :  { %160 = vsyncpa [#allocation3], 1 }
 0x169   :  { %161 = vsyncpa [#allocation6], 1 }
 0x16a   :  { %162 = vsyncpa [#allocation4], 1 }
 0x16b   :  { %163 = vsyncpa [#allocation9], 1 }

</bundles_post_ra>
